<compile_context>
chip_gen: v7x
topology: tpu7x:2x2x1
jax: 0.10.0
libtpu: 0.0.40
codegen_flags: <defaults>
</compile_context>

<pallas_src>
import functools

import jax
import jax.numpy as jnp
from jax.experimental import pallas as pl
from jax.experimental.pallas import tpu as pltpu


def _round_up(n, m):
    return ((n + m - 1) // m) * m


# ----------------------------------------------------------------------------
# Kernel 1 (one shot, O(E*D)): LayerNorm + gamma/beta applied to the table.
# ----------------------------------------------------------------------------
def _normalize_table_kernel(table_ref, gamma_ref, beta_ref, out_ref, *, eps):
    t = table_ref[...].astype(jnp.float32)                   # (E, D)
    mu = jnp.mean(t, axis=-1, keepdims=True)
    ms = jnp.mean(t * t, axis=-1, keepdims=True)             # one-pass stats
    var = ms - mu * mu                                        # E[x^2] - mu^2
    normed = (t - mu) * jax.lax.rsqrt(var + eps)
    out_ref[...] = (normed * gamma_ref[...].astype(jnp.float32)
                    + beta_ref[...].astype(jnp.float32))


# ----------------------------------------------------------------------------
# Kernel 2 (per row tile): clamp + one-hot MXU gather from the resident,
# pre-normalized table, then store the (TM, D) tile.
# ----------------------------------------------------------------------------
def _gather_kernel(idx_ref, table_ref, out_ref, *, num_embeddings):
    idx = idx_ref[...]                                        # (TM, 1) int32
    # PyTorch truncates to num_embeddings - 1.  Negative indices are out of
    # contract (nn.Embedding would raise); clamping at 0 keeps them finite and
    # also neutralizes the unspecified values in a ragged last block.
    idx = jnp.clip(idx, 0, num_embeddings - 1)

    TM = idx.shape[0]
    E = table_ref.shape[0]

    # One-hot gather on the MXU: (TM, E) @ (E, D) -> (TM, D), f32 accumulate.
    rows = jax.lax.broadcasted_iota(jnp.int32, (TM, E), 1)
    onehot = (rows == idx).astype(jnp.float32)
    emb = jnp.dot(onehot, table_ref[...],
                  preferred_element_type=jnp.float32)
    # Dropout with p=None is Identity (module default).
    out_ref[...] = emb.astype(out_ref.dtype)


# ----------------------------------------------------------------------------
# Wrapper
# ----------------------------------------------------------------------------
def _choose_tile_rows(n_rows):
    # HBM-write-bound: big tiles amortize the ~0.35 us per-grid-step overhead.
    tm = min(512, _round_up(max(n_rows, 1), 8))
    # v7x has 2 TensorCores per chip: keep >= 2 grid steps whenever there is
    # enough work to split, so the "parallel" axis can feed both cores.
    if pl.cdiv(n_rows, tm) < 2 and n_rows > 8:
        tm = _round_up(pl.cdiv(n_rows, 2), 8)
    return tm


def learnable_positional_embedding(emb_indices, table, gamma, beta, *,
                                   eps=1e-5, tile_rows=None):
    """emb_indices: int array of any shape; table: (E, D); gamma/beta: (1, D)."""
    input_shape = emb_indices.shape
    E, D = table.shape
    out_dtype = table.dtype
    # NOTE: D is assumed lane-dense (multiple of 128).  If a config ever uses
    # a smaller / unaligned D, pad the table columns wrapper-side so output
    # stores stay unmasked.

    # --- one-shot table normalization (kept in f32, table is tiny) ----------
    norm_table = pl.pallas_call(
        functools.partial(_normalize_table_kernel, eps=eps),
        out_shape=jax.ShapeDtypeStruct((E, D), jnp.float32),
    )(table, gamma, beta)

    # --- per-row gather over the flattened index list ------------------------
    idx_flat = emb_indices.reshape(-1).astype(jnp.int32)
    N = idx_flat.shape[0]
    idx_2d = idx_flat.reshape(N, 1)

    TM = _choose_tile_rows(N) if tile_rows is None else _round_up(tile_rows, 8)
    grid = (pl.cdiv(N, TM),)
    # Ragged last block (N % TM != 0) is handled by Pallas: OOB index reads are
    # unspecified (clamped in-kernel), OOB output writes are dropped.  No host
    # padding, no post-kernel slice copy.

    # VMEM budget: double-buffered output tiles + index tiles + resident table
    # (counted twice in case single-buffering is not honored), with 2x margin.
    itemsize = jnp.dtype(out_dtype).itemsize
    vmem_need = 2 * TM * D * itemsize + 2 * TM * 4 + 2 * E * D * 4
    vmem_limit = int(min(max(2 * vmem_need, 32 * 1024 * 1024),
                         64 * 1024 * 1024))

    out = pl.pallas_call(
        functools.partial(_gather_kernel, num_embeddings=E),
        out_shape=jax.ShapeDtypeStruct((N, D), out_dtype),
        grid=grid,
        in_specs=[
            pl.BlockSpec((TM, 1), lambda i: (i, 0)),          # index tile
            # Full pre-normalized table resident in VMEM across every grid
            # step; constant index_map + single buffering (no pointless
            # double-buffer of a constant block).
            pl.BlockSpec((E, D), lambda i: (0, 0),
                         pipeline_mode=pl.Buffered(1)),
        ],
        out_specs=pl.BlockSpec((TM, D), lambda i: (i, 0)),
        compiler_params=pltpu.CompilerParams(
            dimension_semantics=("parallel",),
            vmem_limit_bytes=vmem_limit),
    )(idx_2d, norm_table)

    # TODO(synk): training-mode dropout (p > 0) would use pltpu.prng_seed /
    # pltpu.stateful_bernoulli inside the gather kernel; the module default
    # (None) is Identity, which is what is implemented here.
    return out.reshape(*input_shape, D)


# ----------------------------------------------------------------------------
# Pure-JAX reference (silent correctness check)
# ----------------------------------------------------------------------------
def _reference(emb_indices, table, gamma, beta, eps=1e-5):
    E, D = table.shape
    idx = jnp.minimum(emb_indices.reshape(-1), E - 1)
    emb = jnp.take(table, idx, axis=0).astype(jnp.float32)
    mu = emb.mean(-1, keepdims=True)
    var = ((emb - mu) ** 2).mean(-1, keepdims=True)
    out = (emb - mu) * jax.lax.rsqrt(var + eps) * gamma + beta
    return out.reshape(*emb_indices.shape, D).astype(table.dtype)


# ----------------------------------------------------------------------------
if __name__ == "__main__":
    B, L = 2, 8                      # index tensor shape (B, L)
    NUM_EMB, D = 16, 128             # small table, lane-dense embedding dim

    key = jax.random.PRNGKey(0)
    k_idx, k_tab, k_g, k_b = jax.random.split(key, 4)

    # Some indices exceed NUM_EMB - 1 to exercise the truncation path.
    emb_indices = jax.random.randint(k_idx, (B, L), 0, NUM_EMB + 8, jnp.int32)
    table = 0.02 * jax.random.normal(k_tab, (NUM_EMB, D), jnp.float32)
    gamma = 1.0 + 0.1 * jax.random.normal(k_g, (1, D), jnp.float32)
    beta = 0.1 * jax.random.normal(k_b, (1, D), jnp.float32)

    out = learnable_positional_embedding(emb_indices, table, gamma, beta)
    jax.block_until_ready(out)

    ref = _reference(emb_indices, table, gamma, beta)

    assert out.shape == (B, L, D)
    assert bool(jnp.all(jnp.isfinite(out)))
    assert bool(jnp.allclose(out, ref, atol=1e-4, rtol=1e-4))
    print("KERNEL_OK")
</pallas_src>

<mosaic_0001>
module attributes {stable_mosaic.version = 11 : i64} {
  func.func @_normalize_table_kernel(%arg0: memref<16x128xf32, #tpu.memory_space<vmem>>, %arg1: memref<1x128xf32, #tpu.memory_space<vmem>>, %arg2: memref<1x128xf32, #tpu.memory_space<vmem>>, %arg3: memref<16x128xf32, #tpu.memory_space<vmem>>) attributes {dimension_semantics = [], scalar_prefetch = 0 : i64, scratch_operands = 0 : i64, tpu.core_type = #tpu.core_type<tc>} {
    %c0 = arith.constant 0 : index
    %c0_0 = arith.constant 0 : index
    %0 = vector.load %arg0[%c0, %c0_0] : memref<16x128xf32, #tpu.memory_space<vmem>>, vector<16x128xf32>
    %cst = arith.constant dense<0.000000e+00> : vector<16xf32>
    %1 = vector.multi_reduction <add>, %0, %cst [1] : vector<16x128xf32> to vector<16xf32>
    %2 = vector.shape_cast %1 : vector<16xf32> to vector<16x1xf32>
    %cst_1 = arith.constant 1.280000e+02 : f32
    %3 = vector.broadcast %cst_1 : f32 to vector<16x1xf32>
    %4 = arith.divf %2, %3 : vector<16x1xf32>
    %5 = arith.mulf %0, %0 : vector<16x128xf32>
    %cst_2 = arith.constant dense<0.000000e+00> : vector<16xf32>
    %6 = vector.multi_reduction <add>, %5, %cst_2 [1] : vector<16x128xf32> to vector<16xf32>
    %7 = vector.shape_cast %6 : vector<16xf32> to vector<16x1xf32>
    %cst_3 = arith.constant 1.280000e+02 : f32
    %8 = vector.broadcast %cst_3 : f32 to vector<16x1xf32>
    %9 = arith.divf %7, %8 : vector<16x1xf32>
    %10 = arith.mulf %4, %4 : vector<16x1xf32>
    %11 = arith.subf %9, %10 : vector<16x1xf32>
    %12 = vector.broadcast %4 : vector<16x1xf32> to vector<16x128xf32>
    %13 = arith.subf %0, %12 : vector<16x128xf32>
    %cst_4 = arith.constant 9.99999974E-6 : f32
    %14 = vector.broadcast %cst_4 : f32 to vector<16x1xf32>
    %15 = arith.addf %11, %14 : vector<16x1xf32>
    %16 = math.rsqrt %15 : vector<16x1xf32>
    %17 = vector.broadcast %16 : vector<16x1xf32> to vector<16x128xf32>
    %18 = arith.mulf %13, %17 : vector<16x128xf32>
    %c0_5 = arith.constant 0 : index
    %c0_6 = arith.constant 0 : index
    %19 = vector.load %arg1[%c0_5, %c0_6] : memref<1x128xf32, #tpu.memory_space<vmem>>, vector<1x128xf32>
    %20 = vector.broadcast %19 : vector<1x128xf32> to vector<16x128xf32>
    %21 = arith.mulf %18, %20 : vector<16x128xf32>
    %c0_7 = arith.constant 0 : index
    %c0_8 = arith.constant 0 : index
    %22 = vector.load %arg2[%c0_7, %c0_8] : memref<1x128xf32, #tpu.memory_space<vmem>>, vector<1x128xf32>
    %23 = vector.broadcast %22 : vector<1x128xf32> to vector<16x128xf32>
    %24 = arith.addf %21, %23 : vector<16x128xf32>
    %c0_9 = arith.constant 0 : index
    %c0_10 = arith.constant 0 : index
    %25 = vector.load %arg3[%c0_9, %c0_10] : memref<16x128xf32, #tpu.memory_space<vmem>>, vector<16x128xf32>
    tpu.vector_store %arg3[%c0_9, %c0_10], %24 {strides = array<i32>} : memref<16x128xf32, #tpu.memory_space<vmem>>, vector<16x128xf32>,
    return
  }
}

</mosaic_0001>

<bundles_post_ra>
// kernel: tpu_custom_call.1
= control target key start
LH: loop header
LB: loop body
LE: loop exit
PB: predicated region body
PF: predicated region fallthrough
CT: control target
= control target key end

     0   :  { %8 = vsyncpa [#allocation3], 0  ;;  %s213_s0 = inlined_call_operand.hbm [shape: f32[16,128], index: 0, kind: input, shape index: {}]   ;;  %s214_s1 = inlined_call_operand.vmem [shape: f32[1,128], index: 1, kind: input, shape index: {}]   ;;  %s215_s2 = inlined_call_operand.vmem [shape: f32[1,128], index: 2, kind: input, shape index: {}]   ;;  %s216_s3 = inlined_call_operand.hbm [shape: f32[16,128], index: 3, kind: output, shape index: {}]  }
   0x1   :  { %9 = vsyncpa [#allocation4], 0  ;;  %s153_s12 = smov [#allocation2]   ;;  %s105_s16 = scalar_lea.hbm %s213_s0, 256 }
   0x2   :  { %s15_s13 = sshll.u32 %s153_s12, 4  ;;  %p106_p0 = scmp.ne.s32.totalorder %s213_s0, %s105_s16  ;;  %s16_s13 = int_to_ptr.vmem [resolvable:$true] %s15_s13 }
   0x3   :  { %p109_p1 = scmp.lt.u32.totalorder %s105_s16, %s213_s0 }
   0x5   :  { %p111_p2 = pnand %p109_p1, %p106_p0 }
   0x7   :  { %114 = shalt.err (!%p111_p2)
}
   0x8   :  { %s115_s21 = scalar_lea.vmem %s16_s13, 256  ;;  %p120_p4 = scmp.lt.s32.totalorder %s16_s13, %s16_s13 }
   0x9   :  { %p116_p3 = scmp.ne.s32.totalorder %s16_s13, %s115_s21  ;;  %p121_p5 = scmp.lt.s32.totalorder %s115_s21, %s115_s21 }
   0xb   :  { %p122_p6 = por %p121_p5, %p120_p4 }
   0xd   :  { %p123_p7 = pnand %p122_p6, %p116_p3 }
   0xf   :  { %126 = shalt.err (!%p123_p7)
}
  0x10   :  { %s154_s22 = smov 128   ;;  %s155_s23 = smov 8  }
  0x11   :  { %21 = dma.hbm_to_vmem [thread:$0]  %s213_s0, 256, %s16_s13, [#allocation3], %s154_s22, %s154_s22, %s155_s23  }
  0x12   :  { %149 = dma.done.wait [#allocation3], 256  }
  0x13   :  { %150 = vsyncadd [#allocation3], 4294967040  ;;  %v29_v0 = vld [vmem:[#allocation2] sm:$0xff]  ;;  %v30_v1 = vld [vmem:[#allocation2 + $0x8] sm:$0xff]  ;;  %s156_s29 = smov [#allocation5]  }
  0x14   :  { %31 = vadd.xlane.f32.xlu0 %v29_v0  ;;  %v38_v2 = vmul.f32 %v29_v0, %v29_v0  ;;  %v39_v3 = vmul.f32 %v30_v1, %v30_v1  ;;  %v95_v20 = vld [vmem:[%s214_s1] ss:$0 sm:$0xff]  ;;  %s83_s30 = sshll.u32 %s156_s29, 4  ;;  %s84_s30 = int_to_ptr.vmem [resolvable:$true] %s83_s30 }
  0x15   :  { %v96_v22 = vld [vmem:[%s215_s2] ss:$0 sm:$0xff]  ;;  %s127_s4 = scalar_lea.vmem %s84_s30, 256  ;;  %p132_p9 = scmp.lt.s32.totalorder %s84_s30, %s84_s30 }
  0x16   :  { %40 = vadd.xlane.f32.xlu1 %v38_v2  ;;  %p128_p8 = scmp.ne.s32.totalorder %s84_s30, %s127_s4  ;;  %p133_p10 = scmp.lt.s32.totalorder %s127_s4, %s127_s4 }
  0x18   :  { %33 = vadd.xlane.f32.xlu0 %v30_v1  ;;  %p134_p11 = por %p133_p10, %p132_p9 }
  0x1a   :  { %42 = vadd.xlane.f32.xlu1 %v39_v3  ;;  %p135_p12 = pnand %p134_p11, %p128_p8 }
  0xa1   :  { %v32_v4 = vpop.xlane.xlu0 %31 }
  0xa2   :  { %v36_v5 = vmul.f32 0.0078125, %v32_v4 }
  0xa3   :  { %v41_v6 = vpop.xlane.xlu1 %40 }
  0xa4   :  { %v46_v7 = vmul.f32 %v36_v5, %v36_v5  ;;  %v44_v8 = vmul.f32 0.0078125, %v41_v6  ;;  %v50_v18 = vsub.f32 %v29_v0, %v36_v5 }
  0xa5   :  { %v34_v9 = vpop.xlane.xlu0 %33 }
  0xa6   :  { %v48_v10 = vsub.f32 %v44_v8, %v46_v7  ;;  %v37_v11 = vmul.f32 0.0078125, %v34_v9 }
  0xa7   :  { %v43_v12 = vpop.xlane.xlu1 %42 }
  0xa8   :  { %v52_v13 = vadd.f32 1e-05, %v48_v10  ;;  %v47_v14 = vmul.f32 %v37_v11, %v37_v11  ;;  %v45_v15 = vmul.f32 0.0078125, %v43_v12  ;;  %v51_v23 = vsub.f32 %v30_v1, %v37_v11 }
  0xaa   :  { %101 = vrsqrt.f32 %v52_v13  ;;  %v49_v16 = vsub.f32 %v45_v15, %v47_v14 }
  0xac   :  { %v53_v17 = vadd.f32 1e-05, %v49_v16 }
  0xae   :  { %103 = vrsqrt.f32 %v53_v17 }
  0xb4   :  { %v102_v19 = vpop.eup %101 }
  0xb5   :  { %v56_v21 = vmul.f32 %v102_v19, %v50_v18 }
  0xb7   :  { %v65_v24 = vmul.f32 %v95_v20, %v56_v21 }
  0xb8   :  { %v104_v25 = vpop.eup %103 }
  0xb9   :  { %v57_v26 = vmul.f32 %v104_v25, %v51_v23  ;;  %v74_v27 = vadd.f32 %v96_v22, %v65_v24 }
  0xbb   :  { %v66_v28 = vmul.f32 %v95_v20, %v57_v26  ;;  %76 = vst [vmem:[#allocation5] sm:$0xff] %v74_v27 }
  0xbd   :  { %v75_v29 = vadd.f32 %v96_v22, %v66_v28 }
  0xbf   :  { %77 = vst [vmem:[#allocation5 + $0x8] sm:$0xff] %v75_v29 }
  0xc0   :  { %138 = shalt.err (!%p135_p12)
}
  0xc1   :  { %s139_s5 = scalar_lea.hbm %s216_s3, 256 }
  0xc2   :  { %p140_p13 = scmp.ne.s32.totalorder %s216_s3, %s139_s5  ;;  %p143_p0 = scmp.lt.u32.totalorder %s139_s5, %s216_s3 }
  0xc4   :  { %p145_p1 = pnand %p143_p0, %p140_p13 }
  0xc6   :  { %148 = shalt.err (!%p145_p1)
}
  0xc7   :  { %89 = dma.vmem_to_hbm [thread:$0]  %s84_s30, 256, %s216_s3, [#allocation4], %s154_s22, %s154_s22, %s155_s23  }
  0xc8   :  { %151 = dma.done.wait [#allocation4], 256  }
  0xc9   :  { %152 = vsyncadd [#allocation4], 4294967040 }
  0xca   :  { %93 = vsyncpa [#allocation3], 1 }
  0xcb   :  { %94 = vsyncpa [#allocation4], 1 }

</bundles_post_ra>
